<compile_context>
chip_gen: v7x
topology: tpu7x:2x2x1
jax: 0.10.0
libtpu: 0.0.40
codegen_flags: <defaults>
</compile_context>

<pallas_src>
import functools

import jax
import jax.numpy as jnp
from jax.experimental import pallas as pl
from jax.experimental.pallas import tpu as pltpu

M_MARGIN = 0.35
S_SCALE = 30.0


def _l2_normalize_rows(x):
    # matches F.normalize(p=2, dim=1): x / max(||x||_2, 1e-12)
    norm = jnp.sqrt(jnp.sum(x * x, axis=1, keepdims=True))
    return x * (1.0 / jnp.maximum(norm, 1e-12))


def _cosine(feat_ref, w_ref):
    x = feat_ref[...].astype(jnp.float32)        # (tb, D)
    w = w_ref[...].astype(jnp.float32)           # (C, D)
    xn = _l2_normalize_rows(x)
    wn = _l2_normalize_rows(w)
    # cos = xn @ wn.T : contract the feature dim of both operands on the MXU
    # (no explicit transpose needed).  HIGHEST precision so it matches an f32
    # reference closely.
    return jax.lax.dot_general(
        xn, wn, (((1,), (1,)), ((), ())),
        precision=jax.lax.Precision.HIGHEST,
        preferred_element_type=jnp.float32)       # (tb, C)


def _amsoftmax_loss_kernel(feat_ref, w_ref, lbl_ref, loss_ref, *, m, s):
    cos = _cosine(feat_ref, w_ref)                               # (tb, C)
    lbl = lbl_ref[...]                                           # (tb, 1) int32

    class_ids = jax.lax.broadcasted_iota(jnp.int32, cos.shape, 1)
    onehot = (class_ids == lbl).astype(jnp.float32)              # (tb, C)

    # additive margin: subtract m only at the target class and only where
    # cos > m  (matches `mask = (onehot_label * cos > m).float()`).
    mask = ((onehot * cos) > m).astype(jnp.float32)
    logits = (cos - mask * m) * s

    # numerically-stable per-row cross entropy: lse(logits) - logits[label]
    row_max = jnp.max(logits, axis=1, keepdims=True)
    lse = jnp.log(jnp.sum(jnp.exp(logits - row_max), axis=1, keepdims=True)) + row_max
    tgt = jnp.sum(onehot * logits, axis=1, keepdims=True)
    loss_ref[...] = lse - tgt                                    # (tb, 1)


def _amsoftmax_pred_kernel(feat_ref, w_ref, pred_ref, *, s):
    cos = _cosine(feat_ref, w_ref)                               # (tb, C)
    logits = cos * s
    row_max = jnp.max(logits, axis=1, keepdims=True)
    e = jnp.exp(logits - row_max)
    pred_ref[...] = (e / jnp.sum(e, axis=1, keepdims=True)).astype(pred_ref.dtype)


def _pick_batch_tile(B):
    if B <= 512:
        return B
    for tb in (512, 256, 128, 64, 8):
        if B % tb == 0:
            return tb
    return B


def amsoftmax_forward(feature, weight, label=None, *, m=M_MARGIN, s=S_SCALE):
    """Functional equivalent of AMSoftMaxLoss.forward.

    feature: (B, D), weight: (C, D)  (nn.Linear weight, bias=False)
    Returns {'loss': scalar} if label is given, else {'main_out': (B, C) softmax}.
    """
    assert feature.ndim == 2
    B, D = feature.shape
    C, D2 = weight.shape
    assert D == D2

    tb = _pick_batch_tile(B)
    grid = (B // tb,)
    cparams = pltpu.CompilerParams(dimension_semantics=("parallel",))

    feat_spec = pl.BlockSpec((tb, D), lambda i: (i, 0))
    w_spec = pl.BlockSpec((C, D), lambda i: (0, 0))

    if label is None:
        kernel = functools.partial(_amsoftmax_pred_kernel, s=s)
        pred = pl.pallas_call(
            kernel,
            out_shape=jax.ShapeDtypeStruct((B, C), jnp.float32),
            grid_spec=pltpu.PrefetchScalarGridSpec(
                num_scalar_prefetch=0,
                grid=grid,
                in_specs=[feat_spec, w_spec],
                out_specs=pl.BlockSpec((tb, C), lambda i: (i, 0)),
            ),
            compiler_params=cparams,
        )(feature, weight)
        return {"main_out": pred}

    assert label.ndim == 1 and label.shape[0] == B
    lbl2d = label.astype(jnp.int32).reshape(B, 1)
    kernel = functools.partial(_amsoftmax_loss_kernel, m=m, s=s)
    per_sample = pl.pallas_call(
        kernel,
        out_shape=jax.ShapeDtypeStruct((B, 1), jnp.float32),
        grid_spec=pltpu.PrefetchScalarGridSpec(
            num_scalar_prefetch=0,
            grid=grid,
            in_specs=[feat_spec, w_spec, pl.BlockSpec((tb, 1), lambda i: (i, 0))],
            out_specs=pl.BlockSpec((tb, 1), lambda i: (i, 0)),
        ),
        compiler_params=cparams,
    )(feature, weight, lbl2d)
    # nn.CrossEntropyLoss default reduction='mean': tiny (B,)->scalar in the wrapper.
    return {"loss": jnp.mean(per_sample)}


# ----------------------------- pure-JAX reference ----------------------------
def _reference(feature, weight, label=None, m=M_MARGIN, s=S_SCALE):
    def l2n(x):
        n = jnp.sqrt(jnp.sum(x * x, axis=1, keepdims=True))
        return x / jnp.maximum(n, 1e-12)

    xn = l2n(feature.astype(jnp.float32))
    wn = l2n(weight.astype(jnp.float32))
    cos = jnp.matmul(xn, wn.T, precision=jax.lax.Precision.HIGHEST)
    if label is None:
        return jax.nn.softmax(cos * s, axis=1)
    onehot = jax.nn.one_hot(label, weight.shape[0], dtype=jnp.float32)
    mask = ((onehot * cos) > m).astype(jnp.float32)
    logits = (cos - mask * m) * s
    logp = jax.nn.log_softmax(logits, axis=1)
    return -jnp.mean(jnp.sum(onehot * logp, axis=1))


if __name__ == "__main__":
    key = jax.random.PRNGKey(0)
    k1, k2, k3 = jax.random.split(key, 3)

    B, D, C = 2, 32, 10            # batch=2, inchannel=32, n_class=10
    feature = jax.random.normal(k1, (B, D), jnp.float32)
    # nn.Linear(bias=False) weight, shape (n_class, inchannel)
    weight = jax.random.uniform(k2, (C, D), jnp.float32,
                                minval=-1.0 / jnp.sqrt(D), maxval=1.0 / jnp.sqrt(D))
    label = jax.random.randint(k3, (B,), 0, C)

    # loss branch (label given)
    loss = jax.block_until_ready(amsoftmax_forward(feature, weight, label)["loss"])
    loss_ref = jax.block_until_ready(_reference(feature, weight, label))
    assert jnp.allclose(loss, loss_ref, rtol=1e-4, atol=1e-4), (loss, loss_ref)

    # inference branch (label=None -> softmax predictions)
    pred = jax.block_until_ready(amsoftmax_forward(feature, weight, None)["main_out"])
    pred_ref = jax.block_until_ready(_reference(feature, weight, None))
    assert jnp.allclose(pred, pred_ref, rtol=1e-4, atol=1e-4), (pred, pred_ref)

    print("KERNEL_OK")
</pallas_src>

<mosaic_0001>
module attributes {stable_mosaic.version = 11 : i64} {
  func.func @_amsoftmax_loss_kernel(%arg0: i32, %arg1: memref<2x32xf32, #tpu.memory_space<vmem>>, %arg2: memref<10x32xf32, #tpu.memory_space<vmem>>, %arg3: memref<2x1xi32, #tpu.memory_space<vmem>>, %arg4: memref<2x1xf32, #tpu.memory_space<vmem>>) attributes {dimension_semantics = [#tpu.dimension_semantics<parallel>], iteration_bounds = array<i64: 1>, scalar_prefetch = 0 : i64, scratch_operands = 0 : i64, tpu.core_type = #tpu.core_type<tc>, window_params = [{transform_indices = @transform_0, window_bounds = array<i64: 2, 32>}, {pipeline_mode = #tpu.pipeline_mode<synchronous>, transform_indices = @transform_1, window_bounds = array<i64: 10, 32>}, {transform_indices = @transform_2, window_bounds = array<i64: 2, 1>}, {transform_indices = @transform_3, window_bounds = array<i64: 2, 1>}]} {
    %c0 = arith.constant 0 : index
    %c0_0 = arith.constant 0 : index
    %0 = vector.load %arg1[%c0, %c0_0] : memref<2x32xf32, #tpu.memory_space<vmem>>, vector<2x32xf32>
    %c0_1 = arith.constant 0 : index
    %c0_2 = arith.constant 0 : index
    %1 = vector.load %arg2[%c0_1, %c0_2] : memref<10x32xf32, #tpu.memory_space<vmem>>, vector<10x32xf32>
    %2 = arith.mulf %0, %0 : vector<2x32xf32>
    %cst = arith.constant dense<0.000000e+00> : vector<2xf32>
    %3 = vector.multi_reduction <add>, %2, %cst [1] : vector<2x32xf32> to vector<2xf32>
    %4 = vector.shape_cast %3 : vector<2xf32> to vector<2x1xf32>
    %5 = math.sqrt %4 : vector<2x1xf32>
    %cst_3 = arith.constant 9.99999996E-13 : f32
    %6 = vector.broadcast %cst_3 : f32 to vector<2x1xf32>
    %7 = arith.maximumf %5, %6 : vector<2x1xf32>
    %cst_4 = arith.constant 1.000000e+00 : f32
    %8 = vector.broadcast %cst_4 : f32 to vector<2x1xf32>
    %9 = arith.divf %8, %7 : vector<2x1xf32>
    %10 = vector.broadcast %9 : vector<2x1xf32> to vector<2x32xf32>
    %11 = arith.mulf %0, %10 : vector<2x32xf32>
    %12 = arith.mulf %1, %1 : vector<10x32xf32>
    %cst_5 = arith.constant dense<0.000000e+00> : vector<10xf32>
    %13 = vector.multi_reduction <add>, %12, %cst_5 [1] : vector<10x32xf32> to vector<10xf32>
    %14 = vector.shape_cast %13 : vector<10xf32> to vector<10x1xf32>
    %15 = math.sqrt %14 : vector<10x1xf32>
    %cst_6 = arith.constant 9.99999996E-13 : f32
    %16 = vector.broadcast %cst_6 : f32 to vector<10x1xf32>
    %17 = arith.maximumf %15, %16 : vector<10x1xf32>
    %cst_7 = arith.constant 1.000000e+00 : f32
    %18 = vector.broadcast %cst_7 : f32 to vector<10x1xf32>
    %19 = arith.divf %18, %17 : vector<10x1xf32>
    %20 = vector.broadcast %19 : vector<10x1xf32> to vector<10x32xf32>
    %21 = arith.mulf %1, %20 : vector<10x32xf32>
    %cst_8 = arith.constant dense<0.000000e+00> : vector<2x10xf32>
    %22 = tpu.matmul %11, %21, %cst_8 {dimension_numbers = #tpu.dot_dimension_numbers<[1], [1], [0], [0], [0, 0, 1, 0], [], []>, precision = #tpu.contract_precision<fp32>} : vector<2x32xf32>, vector<10x32xf32>, vector<2x10xf32> -> vector<2x10xf32>
    %c0_9 = arith.constant 0 : index
    %c0_10 = arith.constant 0 : index
    %23 = vector.load %arg3[%c0_9, %c0_10] : memref<2x1xi32, #tpu.memory_space<vmem>>, vector<2x1xi32>
    %24 = tpu.iota {dimensions = array<i32: 1>} : vector<2x10xi32>
    %25 = vector.broadcast %23 : vector<2x1xi32> to vector<2x10xi32>
    %26 = arith.cmpi eq, %24, %25 : vector<2x10xi32>
    %27 = arith.extui %26 : vector<2x10xi1> to vector<2x10xi32>
    %28 = arith.sitofp %27 : vector<2x10xi32> to vector<2x10xf32>
    %29 = arith.mulf %28, %22 : vector<2x10xf32>
    %cst_11 = arith.constant 3.500000e-01 : f32
    %30 = vector.broadcast %cst_11 : f32 to vector<2x10xf32>
    %31 = arith.cmpf ogt, %29, %30 : vector<2x10xf32>
    %32 = arith.extui %31 : vector<2x10xi1> to vector<2x10xi32>
    %33 = arith.sitofp %32 : vector<2x10xi32> to vector<2x10xf32>
    %cst_12 = arith.constant 3.500000e-01 : f32
    %34 = vector.broadcast %cst_12 : f32 to vector<2x10xf32>
    %35 = arith.mulf %33, %34 : vector<2x10xf32>
    %36 = arith.subf %22, %35 : vector<2x10xf32>
    %cst_13 = arith.constant 3.000000e+01 : f32
    %37 = vector.broadcast %cst_13 : f32 to vector<2x10xf32>
    %38 = arith.mulf %36, %37 : vector<2x10xf32>
    %cst_14 = arith.constant dense<0xFF800000> : vector<2xf32>
    %39 = vector.multi_reduction <maximumf>, %38, %cst_14 [1] : vector<2x10xf32> to vector<2xf32>
    %40 = vector.shape_cast %39 : vector<2xf32> to vector<2x1xf32>
    %41 = vector.broadcast %40 : vector<2x1xf32> to vector<2x10xf32>
    %42 = arith.subf %38, %41 : vector<2x10xf32>
    %43 = math.exp %42 : vector<2x10xf32>
    %cst_15 = arith.constant dense<0.000000e+00> : vector<2xf32>
    %44 = vector.multi_reduction <add>, %43, %cst_15 [1] : vector<2x10xf32> to vector<2xf32>
    %45 = vector.shape_cast %44 : vector<2xf32> to vector<2x1xf32>
    %46 = math.log %45 : vector<2x1xf32>
    %47 = arith.addf %46, %40 : vector<2x1xf32>
    %48 = arith.mulf %28, %38 : vector<2x10xf32>
    %cst_16 = arith.constant dense<0.000000e+00> : vector<2xf32>
    %49 = vector.multi_reduction <add>, %48, %cst_16 [1] : vector<2x10xf32> to vector<2xf32>
    %50 = vector.shape_cast %49 : vector<2xf32> to vector<2x1xf32>
    %51 = arith.subf %47, %50 : vector<2x1xf32>
    %c0_17 = arith.constant 0 : index
    %c0_18 = arith.constant 0 : index
    %52 = vector.load %arg4[%c0_17, %c0_18] : memref<2x1xf32, #tpu.memory_space<vmem>>, vector<2x1xf32>
    tpu.vector_store %arg4[%c0_17, %c0_18], %51 {strides = array<i32>} : memref<2x1xf32, #tpu.memory_space<vmem>>, vector<2x1xf32>,
    return
  }
  func.func @transform_0(%arg0: i32) -> (i32, i32) {
    %c0_i32 = arith.constant 0 : i32
    %c0_i32_0 = arith.constant 0 : i32
    return %arg0, %c0_i32 : i32, i32
  }
  func.func @transform_1(%arg0: i32) -> (i32, i32) {
    %c0_i32 = arith.constant 0 : i32
    %c0_i32_0 = arith.constant 0 : i32
    %c0_i32_1 = arith.constant 0 : i32
    return %c0_i32, %c0_i32_0 : i32, i32
  }
  func.func @transform_2(%arg0: i32) -> (i32, i32) {
    %c0_i32 = arith.constant 0 : i32
    %c0_i32_0 = arith.constant 0 : i32
    return %arg0, %c0_i32 : i32, i32
  }
  func.func @transform_3(%arg0: i32) -> (i32, i32) {
    %c0_i32 = arith.constant 0 : i32
    %c0_i32_0 = arith.constant 0 : i32
    return %arg0, %c0_i32 : i32, i32
  }
}

</mosaic_0001>

<bundles_post_ra>
// kernel: tpu_custom_call.1
= control target key start
LH: loop header
LB: loop body
LE: loop exit
PB: predicated region body
PF: predicated region fallthrough
CT: control target
= control target key end

     0   :  { %8 = vsyncpa [#allocation3], 0  ;;  %s725_s12 = smov [#allocation2]   ;;  %s802_s0 = inlined_call_operand.vmem [shape: f32[2,32], index: 0, kind: input, shape index: {}]   ;;  %s803_s1 = inlined_call_operand.hbm [shape: f32[10,32], index: 1, kind: input, shape index: {}]   ;;  %s804_s2 = inlined_call_operand.vmem [shape: s32[2,1], index: 2, kind: input, shape index: {}]   ;;  %s805_s3 = inlined_call_operand.vmem [shape: f32[2,1], index: 3, kind: output, shape index: {}]  }
   0x1   :  { %s16_s13 = sshll.u32 %s725_s12, 4  ;;  %s701_s16 = scalar_lea.hbm %s803_s1, 256  ;;  %s17_s13 = int_to_ptr.vmem [resolvable:$true] %s16_s13 }
   0x2   :  { %p702_p0 = scmp.ne.s32.totalorder %s803_s1, %s701_s16  ;;  %p705_p1 = scmp.lt.u32.totalorder %s701_s16, %s803_s1 }
   0x4   :  { %p707_p2 = pnand %p705_p1, %p702_p0 }
   0x6   :  { %710 = shalt.err (!%p707_p2)
}
   0x7   :  { %s711_s21 = scalar_lea.vmem %s17_s13, 256  ;;  %p716_p4 = scmp.lt.s32.totalorder %s17_s13, %s17_s13 }
   0x8   :  { %p712_p3 = scmp.ne.s32.totalorder %s17_s13, %s711_s21  ;;  %p717_p5 = scmp.lt.s32.totalorder %s711_s21, %s711_s21 }
   0xa   :  { %p718_p6 = por %p717_p5, %p716_p4 }
   0xc   :  { %p719_p7 = pnand %p718_p6, %p712_p3 }
   0xe   :  { %722 = shalt.err (!%p719_p7)
}
   0xf   :  { %s726_s22 = smov 128   ;;  %s727_s23 = smov 8  }
  0x10   :  { %22 = dma.hbm_to_vmem [thread:$0]  %s803_s1, 256, %s17_s13, [#allocation3], %s726_s22, %s726_s22, %s727_s23  }
  0x11   :  { %723 = dma.done.wait [#allocation3], 256  }
  0x12   :  { %724 = vsyncadd [#allocation3], 4294967040  ;;  %vm49_vm0 = vcmask 261120   ;;  %v29_v0 = vld [vmem:[#allocation2] sm:$0xff]  ;;  %vm32_vm1 = vcmask 254976   ;;  %v728_v9 = vmov 0.0|0.0   ;;  %v547_v62 = vlaneseq }
  0x13   :  { %v28_v1 = vld [vmem:[%s802_s0] sm:$0x3]  ;;  %v767_v2 = vld [vmem:[#allocation2 + $0x8] sm:$0x3]  ;;  %v47_v3 = vmul.f32 %v29_v0, %v29_v0  ;;  %649 = vmatprep.subr.bf16.mxu1 %v728_v9  ;;  %658 = vmatprep.subr.bf16.mxu0 %v728_v9  ;;  %vm729_vm2 = vmmov 0   ;;  %v730_v10 = vmov 0.0  }
  0x14   :  { %v31_v4 = vmul.f32 %v28_v1, %v28_v1  ;;  %v48_v5 = vmul.f32 %v767_v2, %v767_v2  ;;  %611 = vmatprep.mubr.msk.f32.mxu1 %vm729_vm2, %v730_v10  ;;  %632 = vmatprep.mubr.msk.f32.mxu0 %vm729_vm2, %v730_v10  ;;  %v546_v11 = vld [vmem:[%s804_s2] sm:$0x3]  ;;  %v731_v12 = vmov 0   ;;  %v548_v63 = vand.u32 127, %v547_v62 }
  0x15   :  { %v50_v6 = vsel %vm49_vm0, %v47_v3, 0.0  ;;  %683 = vset.pattern.permute.xlu1 %v731_v12  ;;  %684 = vset.pattern.permute.xlu0 %v731_v12  ;;  %vm562_vm11 = vcmask 74752   ;;  %vm580_vm12 = vcmask 1024  }
  0x16   :  { %v33_v7 = vsel %vm32_vm1, %v31_v4, 0.0  ;;  %51 = vadd.xlane.f32.xlu0 %v50_v6  ;;  %v53_v8 = vsel %vm32_vm1, %v48_v5, 0.0 }
  0x17   :  { %34 = vadd.xlane.f32.xlu1 %v33_v7 }
  0x1a   :  { %54 = vadd.xlane.f32.xlu0 %v53_v8 }
  0x28   :  { %550 = vperm.xlu1 %683, %v546_v11  }
  0xa3   :  { %v52_v13 = vpop.xlane.xlu0 %51 }
  0xa4   :  { %v35_v14 = vpop.xlane.xlu1 %34  ;;  %685 = vrsqrt.f32 %v52_v13  ;;  %vm58_vm3 = vcmp.eq.f32.partialorder %v52_v13, inf  ;;  %v61_v19 = vand.u32 2147483648, %v52_v13  ;;  %vm60_vm4 = vcmp.eq.f32.partialorder %v52_v13, 0.0 }
  0xa5   :  { %687 = vrsqrt.f32 %v35_v14  ;;  %vm38_vm5 = vcmp.eq.f32.partialorder %v35_v14, inf  ;;  %v41_v22 = vand.u32 2147483648, %v35_v14  ;;  %vm40_vm6 = vcmp.eq.f32.partialorder %v35_v14, 0.0 }
  0xa7   :  { %v55_v15 = vpop.xlane.xlu0 %54 }
  0xa8   :  { %689 = vrsqrt.f32 %v55_v15  ;;  %vm65_vm7 = vcmp.eq.f32.partialorder %v55_v15, inf  ;;  %v68_v30 = vand.u32 2147483648, %v55_v15  ;;  %vm67_vm8 = vcmp.eq.f32.partialorder %v55_v15, 0.0 }
  0xae   :  { %v686_v16 = vpop.eup %685 }
  0xaf   :  { %v688_v17 = vpop.eup %687  ;;  %v57_v18 = vmul.f32 %v686_v16, %v52_v13 }
  0xb0   :  { %v37_v20 = vmul.f32 %v688_v17, %v35_v14 }
  0xb1   :  { %v59_v21 = vsel %vm58_vm3, %v52_v13, %v57_v18 }
  0xb2   :  { %v690_v23 = vpop.eup %689  ;;  %v62_v24 = vsel %vm60_vm4, %v61_v19, %v59_v21  ;;  %v39_v25 = vsel %vm38_vm5, %v35_v14, %v37_v20 }
  0xb3   :  { %v70_v26 = vmax.f32 %v62_v24, 1e-12  ;;  %v42_v27 = vsel %vm40_vm6, %v41_v22, %v39_v25  ;;  %v64_v28 = vmul.f32 %v690_v23, %v55_v15 }
  0xb4   :  { %v43_v29 = vmax.f32 %v42_v27, 1e-12 }
  0xb5   :  { %691 = vrcp.f32 %v70_v26  ;;  %v66_v31 = vsel %vm65_vm7, %v55_v15, %v64_v28 }
  0xb6   :  { %693 = vrcp.f32 %v43_v29  ;;  %v69_v32 = vsel %vm67_vm8, %v68_v30, %v66_v31 }
  0xb7   :  { %v71_v33 = vmax.f32 %v69_v32, 1e-12 }
  0xb9   :  { %695 = vrcp.f32 %v71_v33 }
  0xbf   :  { %v692_v34 = vpop.eup %691 }
  0xc0   :  { %v694_v35 = vpop.eup %693  ;;  %v76_v36 = vmul.f32 %v692_v34, %v29_v0  ;;  %v551_v0 = vpop.permute.xlu1 %550 }
  0xc1   :  { %v46_v37 = vmul.f32 %v694_v35, %v28_v1  ;;  %vm552_vm9 = vcmp.eq.s32.totalorder %v548_v63, %v551_v0 }
  0xc2   :  { %v82_v38 = vsel %vm49_vm0, %v76_v36, 0  ;;  %v587_v3 = vsel %vm552_vm9, 1.0, %v730_v10 }
  0xc3   :  { %v696_v39 = vpop.eup %695  ;;  %v88_v40 = vand.u32 4294901760, %v82_v38  ;;  %v79_v41 = vsel %vm49_vm0, %v46_v37, 0 }
  0xc4   :  { %v77_v42 = vmul.f32 %v696_v39, %v767_v2  ;;  %v154_v43 = vand.u32 4294901760, %v79_v41 }
  0xc5   :  { %v166_v44 = vsub.f32 %v82_v38, %v88_v40 }
  0xc6   :  { %v85_v45 = vsel %vm49_vm0, %v77_v42, 0  ;;  %v155_v46 = vsub.f32 %v79_v41, %v154_v43 }
  0xc7   :  { %v91_v47 = vand.u32 4294901760, %v85_v45  ;;  %v167_v48 = vand.u32 4294901760, %v166_v44 }
  0xc8   :  { %v156_v49 = vand.u32 4294901760, %v155_v46 }
  0xc9   :  { %v650_v50 = vpack.c.bf16 %v91_v47, %v88_v40  ;;  %v173_v51 = vsub.f32 %v85_v45, %v91_v47  ;;  %v168_v52 = vsub.f32 %v166_v44, %v167_v48 }
  0xca   :  { %v157_v54 = vsub.f32 %v155_v46, %v156_v49 }
  0xcb   :  { %651 = vmatpush3.bf16.xpose.msra.mxu1 %v650_v50  ;;  %660 = vmatpush3.bf16.xpose.msra.mxu0 %v650_v50  ;;  %v174_v53 = vand.u32 4294901760, %v173_v51  ;;  %v169_v56 = vand.u32 4294901760, %v168_v52  ;;  %v656_v61 = vpack.c.bf16 %v173_v51, %v166_v44 }
  0xcc   :  { %652 = vmatprep.subr.bf16.mxu1 %v728_v9  ;;  %661 = vmatprep.subr.bf16.mxu0 %v728_v9  ;;  %v158_v58 = vand.u32 4294901760, %v157_v54 }
  0xcd   :  { %v175_v55 = vsub.f32 %v173_v51, %v174_v53  ;;  %v662_v60 = vpack.c.bf16 %v174_v53, %v167_v48 }
  0xcf   :  { %v176_v57 = vand.u32 4294901760, %v175_v55 }
  0xd1   :  { %v653_v59 = vpack.c.bf16 %v176_v57, %v169_v56 }
  0xd2   :  { %612 = vmatmul.mubr.f32.vlgmr.msra.gmra.mrb[0].mxu1 %v158_v58  ;;  %633 = vmatmul.mubr.f32.vlgmr.msra.gmra.mrb[0].mxu0 %v156_v49 }
  0xd3   :  { %654 = vmatpush3.bf16.xpose.msra.mxu1 %v653_v59  ;;  %663 = vmatpush3.bf16.xpose.msra.mxu0 %v662_v60 }
  0xd4   :  { %618 = vmatprep.mubr.msk.f32.mxu1 %vm729_vm2, %v730_v10  ;;  %639 = vmatprep.mubr.msk.f32.mxu0 %vm729_vm2, %v730_v10 }
  0xd5   :  { %655 = vmatprep.subr.bf16.mxu1 %v728_v9  ;;  %664 = vmatprep.subr.bf16.mxu0 %v728_v9 }
  0xda   :  { %619 = vmatmul.mubr.f32.vlgmr.msra.gmra.mrb[0].mxu1 %v154_v43  ;;  %640 = vmatmul.mubr.f32.vlgmr.msra.gmra.mrb[0].mxu0 %v154_v43 }
  0xdb   :  { %657 = vmatpush3.bf16.xpose.msra.mxu1 %v656_v61  ;;  %666 = vmatpush3.bf16.xpose.msra.mxu0 %v650_v50 }
  0xdc   :  { %625 = vmatprep.mubr.msk.f32.mxu1 %vm729_vm2, %v730_v10  ;;  %646 = vmatprep.mubr.msk.f32.mxu0 %vm729_vm2, %v730_v10 }
  0xe2   :  { %626 = vmatmul.mubr.f32.vlgmr.msra.gmra.mrb[0].mxu1 %v155_v46  ;;  %647 = vmatmul.mubr.f32.vlgmr.msra.gmra.mrb[0].mxu0 %v154_v43 }
 0x1b5   :  { %v317_v1 = vpop.f32.mrb[0].mxu1  ;;  %v542_v2 = vpop.f32.mrb[0].mxu0 }
 0x1b6   :  { %v667_v4 = vadd.f32 %v542_v2, %v317_v1  ;;  %v627_v5 = vpop.f32.mrb[1].mxu1  ;;  %v648_v6 = vpop.f32.mrb[1].mxu0 }
 0x1b8   :  { %v555_v7 = vmul.f32 %v667_v4, %v587_v3 }
 0x1ba   :  { %vm556_vm10 = vcmp.gt.f32.partialorder %v555_v7, 0.35 }
 0x1bb   :  { %v588_v8 = vsel %vm556_vm10, 1.0, %v730_v10 }
 0x1bc   :  { %v559_v9 = vmul.f32 0.35, %v588_v8 }
 0x1be   :  { %v560_v11 = vsub.f32 %v667_v4, %v559_v9 }
 0x1c0   :  { %v561_v12 = vmul.f32 30.0, %v560_v11 }
 0x1c2   :  { %v563_v13 = vsel %vm562_vm11, %v561_v12, -inf  ;;  %v575_v19 = vmul.f32 %v587_v3, %v561_v12 }
 0x1c3   :  { %564 = vmax.xlane.f32.xlu0 %v563_v13 }
 0x1c4   :  { %v576_v20 = vsel %vm562_vm11, %v575_v19, 0.0 }
 0x250   :  { %v565_v14 = vpop.xlane.xlu0 %564 }
 0x251   :  { %v566_v15 = vsub.f32 %v561_v12, %v565_v14 }
 0x253   :  { %v567_v16 = vmul.f32 1.442695, %v566_v15 }
 0x255   :  { %697 = vpow2.f32 %v567_v16 }
 0x25f   :  { %v698_v17 = vpop.eup %697 }
 0x260   :  { %v569_v18 = vsel %vm562_vm11, %v698_v17, 0.0 }
 0x261   :  { %570 = vadd.xlane.f32.xlu0 %v569_v18 }
 0x265   :  { %577 = vadd.xlane.f32.xlu0 %v576_v20 }
 0x2ee   :  { %v571_v21 = vpop.xlane.xlu0 %570 }
 0x2ef   :  { %699 = vlog2.f32 %v571_v21 }
 0x2f2   :  { %v578_v24 = vpop.xlane.xlu0 %577 }
 0x2f9   :  { %v700_v22 = vpop.eup %699 }
 0x2fa   :  { %v573_v10 = vmul.f32 0.6931472, %v700_v22 }
 0x2fc   :  { %v574_v23 = vadd.f32 %v573_v10, %v565_v14 }
 0x2fe   :  { %v579_v25 = vsub.f32 %v574_v23, %v578_v24 }
 0x300   :  { %581 = vst.msk [vmem:[%s805_s3] sm:$0x3] %vm580_vm12, %v579_v25 }
 0x301   :  { %586 = vsyncpa [#allocation3], 1 }

</bundles_post_ra>
